<compile_context>
chip_gen: v6e
topology: v6e:2x2x1
jax: 0.10.0
libtpu: 0.0.40
codegen_flags: <defaults>
</compile_context>

<pallas_src>
import jax
import jax.numpy as jnp
from jax.experimental import pallas as pl
from jax.experimental.pallas import tpu as pltpu


def _critic_kernel(x_ref, w_ref, w3_ref, b3_ref, o_ref):
    """One batch tile of the fused critic forward (feature-major layout).

    x_ref  : (Fp, TB)   [s; a; 1; 0-pad] transposed (bias folded via ones row)
    w_ref  : (128, Fp)  [w1; w2; b1+b2; 0-pad] transposed
    w3_ref : (1, 128)   output projection weight (row)
    b3_ref : (1, 1)     output projection bias
    o_ref  : (1, TB)    lane-dense q values for TB batch rows
    """
    # Fused hidden matmul on the MXU (bias already folded into the K dim),
    # f32 accumulation; only the relu runs on the VPU.
    h = jnp.maximum(
        jnp.dot(w_ref[...], x_ref[...], preferred_element_type=jnp.float32),
        0.0)                                                    # (128, TB) f32
    # 128 -> 1 projection as a second MXU matmul; result is lane-dense so the
    # store is a full-lane unmasked vst.
    o_ref[...] = (
        jnp.dot(w3_ref[...], h, preferred_element_type=jnp.float32)
        + b3_ref[...])                                          # (1, TB)


def critic_forward(s, a, params, *, block_b=4096, use_bf16_inputs=False):
    """q = relu(s @ w1 + b1 + a @ w2 + b2) @ w3 + b3, returned as (B, 1) f32."""
    w1, b1, w2, b2, w3, b3 = params
    B = s.shape[0]
    n_layer = w1.shape[1]
    F = s.shape[1] + a.shape[1]          # contraction dim (state + action)
    Fa = F + 1                           # + ones row for the folded bias
    Fp = ((Fa + 7) // 8) * 8             # sublane-align only (NOT to 128)

    # ---- Batch tiling ------------------------------------------------------
    block_b = max(128, (block_b // 128) * 128)
    Bp_min = ((B + 127) // 128) * 128
    tb = min(block_b, Bp_min)
    # Keep >= 2 grid steps when the batch allows it so the "parallel" axis can
    # shard across v7x's two TensorCores (harmless on v5e/v6e).
    if Bp_min >= 256 and Bp_min <= tb:
        tb = ((Bp_min // 2 + 127) // 128) * 128
    num_blocks = pl.cdiv(Bp_min, tb)
    Bp = num_blocks * tb

    act_dtype = jnp.bfloat16 if use_bf16_inputs else jnp.float32

    # ---- Activations: [s, a, 1], padded, feature-major (batch on lanes) -----
    # One fused expression so XLA can emit a single copy. Padded batch columns
    # are all-zero (including the ones row), so their q = b3 -> sliced off.
    x_aug = jnp.concatenate(
        [s, a, jnp.ones((B, 1), dtype=s.dtype)], axis=1)          # (B, Fa)
    x_t = jnp.pad(x_aug, ((0, Bp - B), (0, Fp - Fa))).T.astype(act_dtype)

    # ---- Weights: fused hidden weight with bias column, padded, transposed --
    w_fused = jnp.concatenate(
        [w1, w2, (b1 + b2).reshape(1, n_layer)], axis=0)          # (Fa, 128)
    w_t = jnp.pad(w_fused, ((0, Fp - Fa), (0, 0))).T.astype(act_dtype)  # (128, Fp)

    w3_row = w3.reshape(1, n_layer).astype(jnp.float32)           # (1, 128)
    b3_s = b3.reshape(1, 1).astype(jnp.float32)                   # (1, 1)

    out = pl.pallas_call(
        _critic_kernel,
        out_shape=jax.ShapeDtypeStruct((1, Bp), jnp.float32),
        grid=(num_blocks,),
        in_specs=[
            # Streamed per-tile activations (default double buffering).
            pl.BlockSpec((Fp, tb), lambda i: (0, i)),
            # Constant-index specs: weights/bias stay VMEM-resident.
            pl.BlockSpec((n_layer, Fp), lambda i: (0, 0)),
            pl.BlockSpec((1, n_layer), lambda i: (0, 0)),
            pl.BlockSpec((1, 1), lambda i: (0, 0)),
        ],
        out_specs=pl.BlockSpec((1, tb), lambda i: (0, i)),
        compiler_params=pltpu.CompilerParams(
            dimension_semantics=("parallel",)),
    )(x_t, w_t, w3_row, b3_s)

    return out[:, :B].T                                           # (B, 1)


def init_params(key, state_dim, action_dim, n_layer=128):
    """Synthetic init mirroring the PyTorch module's shapes.

    Weights ~ N(0, 0.1) (as in the module's __init__); biases use PyTorch's
    default uniform(-1/sqrt(fan_in), 1/sqrt(fan_in)). Weights are stored
    transposed, i.e. (in_features, out_features).
    """
    k1, k2, k3, k4, k5, k6 = jax.random.split(key, 6)
    w1 = 0.1 * jax.random.normal(k1, (state_dim, n_layer), jnp.float32)
    b1 = jax.random.uniform(k2, (1, n_layer), jnp.float32,
                            -1.0 / state_dim ** 0.5, 1.0 / state_dim ** 0.5)
    w2 = 0.1 * jax.random.normal(k3, (action_dim, n_layer), jnp.float32)
    b2 = jax.random.uniform(k4, (1, n_layer), jnp.float32,
                            -1.0 / action_dim ** 0.5, 1.0 / action_dim ** 0.5)
    w3 = 0.1 * jax.random.normal(k5, (n_layer, 1), jnp.float32)
    b3 = jax.random.uniform(k6, (1, 1), jnp.float32,
                            -1.0 / n_layer ** 0.5, 1.0 / n_layer ** 0.5)
    return w1, b1, w2, b2, w3, b3


def critic_ref(s, a, params):
    """Pure-JAX reference for correctness checking."""
    w1, b1, w2, b2, w3, b3 = params
    h = jnp.maximum(s @ w1 + b1 + a @ w2 + b2, 0.0)
    return h @ w3 + b3


if __name__ == "__main__":
    # Small shapes consistent with the module: the surrounding script builds a
    # 4-dim state (rx, ry, vx, vy); pick action_dim=2, batch=8.
    B, state_dim, action_dim = 8, 4, 2

    key = jax.random.PRNGKey(0)
    k_s, k_a, k_p = jax.random.split(key, 3)
    s = jax.random.normal(k_s, (B, state_dim), jnp.float32)
    a = jax.random.normal(k_a, (B, action_dim), jnp.float32)
    params = init_params(k_p, state_dim, action_dim)

    q = critic_forward(s, a, params)
    q = jax.block_until_ready(q)

    q_ref = critic_ref(s, a, params)
    assert q.shape == (B, 1)
    assert jnp.allclose(q, q_ref, atol=1e-4, rtol=1e-4), (
        jnp.max(jnp.abs(q - q_ref)))

    print("KERNEL_OK")
</pallas_src>

<mosaic_0001>
module attributes {stable_mosaic.version = 11 : i64} {
  func.func @_critic_kernel(%arg0: i32, %arg1: memref<8x128xf32, #tpu.memory_space<vmem>>, %arg2: memref<128x8xf32, #tpu.memory_space<vmem>>, %arg3: memref<1x128xf32, #tpu.memory_space<vmem>>, %arg4: memref<1x1xf32, #tpu.memory_space<vmem>>, %arg5: memref<1x128xf32, #tpu.memory_space<vmem>>) attributes {dimension_semantics = [#tpu.dimension_semantics<parallel>], iteration_bounds = array<i64: 1>, scalar_prefetch = 0 : i64, scratch_operands = 0 : i64, tpu.core_type = #tpu.core_type<tc>, window_params = [{transform_indices = @transform_0, window_bounds = array<i64: 8, 128>}, {pipeline_mode = #tpu.pipeline_mode<synchronous>, transform_indices = @transform_1, window_bounds = array<i64: 128, 8>}, {pipeline_mode = #tpu.pipeline_mode<synchronous>, transform_indices = @transform_2, window_bounds = array<i64: 1, 128>}, {pipeline_mode = #tpu.pipeline_mode<synchronous>, transform_indices = @transform_3, window_bounds = array<i64: 1, 1>}, {transform_indices = @transform_4, window_bounds = array<i64: 1, 128>}]} {
    %c0 = arith.constant 0 : index
    %c0_0 = arith.constant 0 : index
    %0 = vector.load %arg2[%c0, %c0_0] : memref<128x8xf32, #tpu.memory_space<vmem>>, vector<128x8xf32>
    %c0_1 = arith.constant 0 : index
    %c0_2 = arith.constant 0 : index
    %1 = vector.load %arg1[%c0_1, %c0_2] : memref<8x128xf32, #tpu.memory_space<vmem>>, vector<8x128xf32>
    %cst = arith.constant dense<0.000000e+00> : vector<128x128xf32>
    %2 = tpu.matmul %0, %1, %cst {dimension_numbers = #tpu.dot_dimension_numbers<[1], [0], [0], [1], [0, 0, 1, 1], [], []>} : vector<128x8xf32>, vector<8x128xf32>, vector<128x128xf32> -> vector<128x128xf32>
    %cst_3 = arith.constant 0.000000e+00 : f32
    %3 = vector.broadcast %cst_3 : f32 to vector<128x128xf32>
    %4 = arith.maximumf %2, %3 : vector<128x128xf32>
    %c0_4 = arith.constant 0 : index
    %c0_5 = arith.constant 0 : index
    %5 = vector.load %arg3[%c0_4, %c0_5] : memref<1x128xf32, #tpu.memory_space<vmem>>, vector<1x128xf32>
    %cst_6 = arith.constant dense<0.000000e+00> : vector<1x128xf32>
    %6 = tpu.matmul %5, %4, %cst_6 {dimension_numbers = #tpu.dot_dimension_numbers<[1], [0], [0], [1], [0, 0, 1, 1], [], []>} : vector<1x128xf32>, vector<128x128xf32>, vector<1x128xf32> -> vector<1x128xf32>
    %c0_7 = arith.constant 0 : index
    %c0_8 = arith.constant 0 : index
    %7 = vector.load %arg4[%c0_7, %c0_8] : memref<1x1xf32, #tpu.memory_space<vmem>>, vector<1x1xf32>
    %8 = vector.broadcast %7 : vector<1x1xf32> to vector<1x128xf32>
    %9 = arith.addf %6, %8 : vector<1x128xf32>
    %c0_9 = arith.constant 0 : index
    %c0_10 = arith.constant 0 : index
    %10 = vector.load %arg5[%c0_9, %c0_10] : memref<1x128xf32, #tpu.memory_space<vmem>>, vector<1x128xf32>
    tpu.vector_store %arg5[%c0_9, %c0_10], %9 {strides = array<i32>} : memref<1x128xf32, #tpu.memory_space<vmem>>, vector<1x128xf32>,
    return
  }
  func.func @transform_0(%arg0: i32) -> (i32, i32) {
    %c0_i32 = arith.constant 0 : i32
    %c0_i32_0 = arith.constant 0 : i32
    return %c0_i32, %arg0 : i32, i32
  }
  func.func @transform_1(%arg0: i32) -> (i32, i32) {
    %c0_i32 = arith.constant 0 : i32
    %c0_i32_0 = arith.constant 0 : i32
    %c0_i32_1 = arith.constant 0 : i32
    return %c0_i32, %c0_i32_0 : i32, i32
  }
  func.func @transform_2(%arg0: i32) -> (i32, i32) {
    %c0_i32 = arith.constant 0 : i32
    %c0_i32_0 = arith.constant 0 : i32
    %c0_i32_1 = arith.constant 0 : i32
    return %c0_i32, %c0_i32_0 : i32, i32
  }
  func.func @transform_3(%arg0: i32) -> (i32, i32) {
    %c0_i32 = arith.constant 0 : i32
    %c0_i32_0 = arith.constant 0 : i32
    %c0_i32_1 = arith.constant 0 : i32
    return %c0_i32, %c0_i32_0 : i32, i32
  }
  func.func @transform_4(%arg0: i32) -> (i32, i32) {
    %c0_i32 = arith.constant 0 : i32
    %c0_i32_0 = arith.constant 0 : i32
    return %c0_i32, %arg0 : i32, i32
  }
}

</mosaic_0001>

<bundles_post_ra>
// kernel: tpu_custom_call.1
= control target key start
LH: loop header
LB: loop body
LE: loop exit
PB: predicated region body
PF: predicated region fallthrough
CT: control target
= control target key end

     0   :  { %s603_s0 = inlined_call_operand.vmem [shape: f32[8,128], index: 0, kind: input, shape index: {}]   ;;  %s604_s1 = inlined_call_operand.vmem [shape: f32[128,8], index: 1, kind: input, shape index: {}]   ;;  %s605_s2 = inlined_call_operand.vmem [shape: f32[1,128], index: 2, kind: input, shape index: {}]   ;;  %s606_s3 = inlined_call_operand.<no memory space> [shape: f32[1,1], index: 3, kind: input, shape index: {}]   ;;  %s607_s4 = inlined_call_operand.hbm [shape: f32[1,128], index: 4, kind: output, shape index: {}]  }
   0x1   :  { %v9_v0 = vstv %s606_s3 }
   0x2   :  { %10 = vst [vmem:[#allocation2] sm:$0x1] %v9_v0 }
   0x3   :  { %v36_v1 = vld [vmem:[%s603_s0] sm:$0xff]  ;;  %vm37_vm0 = vcmask 64512   ;;  %v21_v3 = vld [vmem:[%s604_s1 + $0x8] sm:$0xff]  ;;  %v22_v4 = vld [vmem:[%s604_s1 + $0x10] sm:$0xff] }
   0x4   :  { %v20_v2 = vld [vmem:[%s604_s1] sm:$0xff]  ;;  %393 = vmatprep.subr.mxu0 %v36_v1  ;;  %v23_v5 = vld [vmem:[%s604_s1 + $0x18] sm:$0xff] }
   0x5   :  { %395 = vmatprep.mubr.msk.f32.mxu0 %vm37_vm0, %v20_v2  ;;  %394 = vmatpush3.msra.mxu0 %v36_v1  ;;  %v24_v6 = vld [vmem:[%s604_s1 + $0x20] sm:$0xff] }
   0x6   :  { %396 = vmatmul.mubr.msk.f32.vlgmr.msra.gmra.mxu0 %vm37_vm0, %v21_v3 }
   0x7   :  { %398 = vmatprep.mubr.msk.f32.mxu0 %vm37_vm0, %v22_v4 }
   0x8   :  { %11 = vsyncpa [#allocation4], 0  ;;  %v25_v7 = vld [vmem:[%s604_s1 + $0x28] sm:$0xff]  ;;  %v26_v8 = vld [vmem:[%s604_s1 + $0x30] sm:$0xff]  ;;  %v481_v18 = vmov 0.0   ;;  %vm482_vm1 = vmmov 0   ;;  %v254_v54 = vlaneseq }
   0x9   :  { %v27_v9 = vld [vmem:[%s604_s1 + $0x38] sm:$0xff]  ;;  %v28_v10 = vld [vmem:[%s604_s1 + $0x40] sm:$0xff]  ;;  %v29_v11 = vld [vmem:[%s604_s1 + $0x48] sm:$0xff]  ;;  %419 = vmatprep.subr.mxu1 %v481_v18  ;;  %451 = vmatprep.mubr.msk.f32.mxu1 %vm482_vm1, %v481_v18  ;;  %v483_v20 = vmov 0   ;;  %s484_s24 = smov [#allocation3]  }
   0xa   :  { %399 = vmatmul.mubr.msk.f32.gmra.mxu0 %vm37_vm0, %v23_v5  ;;  %v30_v12 = vld [vmem:[%s604_s1 + $0x50] sm:$0xff]  ;;  %v31_v13 = vld [vmem:[%s604_s1 + $0x58] sm:$0xff]  ;;  %v32_v14 = vld [vmem:[%s604_s1 + $0x60] sm:$0xff]  ;;  %458 = vset.pattern.permute.xlu0 %v483_v20  ;;  %v255_v55 = vshrl.u32 %v254_v54, 7  ;;  %s335_s0 = sshll.u32 %s484_s24, 4  ;;  %s336_s0 = int_to_ptr.vmem [resolvable:$true] %s335_s0 }
   0xb   :  { %401 = vmatprep.mubr.msk.f32.mxu0 %vm37_vm0, %v24_v6  ;;  %v33_v15 = vld [vmem:[%s604_s1 + $0x68] sm:$0xff]  ;;  %v34_v16 = vld [vmem:[%s604_s1 + $0x70] sm:$0xff]  ;;  %v35_v17 = vld [vmem:[%s604_s1 + $0x78] sm:$0xff]  ;;  %s459_s3 = scalar_lea.vmem %s336_s0, 16  ;;  %s463_s25 = scalar_lea.vmem %s336_s0, 32 }
   0xc   :  { %v248_v19 = vld [vmem:[#allocation2] sm:$0x1]  ;;  %v256_v56 = vsub.s32 0, %v255_v55  ;;  %p460_p0 = scmp.ne.s32.totalorder %s336_s0, %s459_s3  ;;  %p464_p1 = scmp.lt.s32.totalorder %s336_s0, %s336_s0 }
   0xd   :  { %251 = vperm.xlu0 %458, %v248_v19   ;;  %v247_v53 = vld [vmem:[%s605_s2] sm:$0x1]  ;;  %p465_p2 = scmp.lt.s32.totalorder %s463_s25, %s459_s3 }
   0xe   :  { %402 = vmatmul.mubr.msk.f32.gmra.mxu0 %vm37_vm0, %v25_v7 }
   0xf   :  { %404 = vmatprep.mubr.msk.f32.mxu0 %vm37_vm0, %v26_v8  ;;  %p466_p3 = por %p465_p2, %p464_p1 }
  0x11   :  { %p467_p4 = pnand %p466_p3, %p460_p0 }
  0x12   :  { %405 = vmatmul.mubr.msk.f32.gmra.mxu0 %vm37_vm0, %v27_v9 }
  0x13   :  { %407 = vmatprep.mubr.msk.f32.mxu0 %vm37_vm0, %v28_v10 }
  0x16   :  { %408 = vmatmul.mubr.msk.f32.gmra.mxu0 %vm37_vm0, %v29_v11 }
  0x17   :  { %410 = vmatprep.mubr.msk.f32.mxu0 %vm37_vm0, %v30_v12 }
  0x1a   :  { %411 = vmatmul.mubr.msk.f32.gmra.mxu0 %vm37_vm0, %v31_v13 }
  0x1b   :  { %413 = vmatprep.mubr.msk.f32.mxu0 %vm37_vm0, %v32_v14 }
  0x1e   :  { %414 = vmatmul.mubr.msk.f32.gmra.mxu0 %vm37_vm0, %v33_v15 }
  0x1f   :  { %416 = vmatprep.mubr.msk.f32.mxu0 %vm37_vm0, %v34_v16 }
  0x22   :  { %417 = vmatmul.mubr.msk.f32.gmra.mxu0 %vm37_vm0, %v35_v17 }
  0x88   :  { %v252_v57 = vpop.permute.xlu0 %251 }
  0x89   :  { %v257_v58 = vrot.slane %v252_v57, %v256_v56 }
  0xc6   :  { %v397_v21 = vpop.f32.mrf.mxu0 }
  0xc7   :  { %v232_v51 = vmax.f32 %v397_v21, 0.0 }
  0xc8   :  { %v152_v22 = vpop.f32.mrf.mxu0 }
  0xc9   :  { %v231_v52 = vmax.f32 %v152_v22, 0.0 }
  0xca   :  { %v400_v23 = vpop.f32.mrf.mxu0 }
  0xcb   :  { %v234_v49 = vmax.f32 %v400_v23, 0.0 }
  0xcc   :  { %v162_v24 = vpop.f32.mrf.mxu0 }
  0xcd   :  { %v233_v50 = vmax.f32 %v162_v24, 0.0 }
  0xce   :  { %v403_v25 = vpop.f32.mrf.mxu0 }
  0xcf   :  { %v236_v47 = vmax.f32 %v403_v25, 0.0 }
  0xd0   :  { %v172_v26 = vpop.f32.mrf.mxu0 }
  0xd1   :  { %v235_v48 = vmax.f32 %v172_v26, 0.0 }
  0xd2   :  { %v406_v27 = vpop.f32.mrf.mxu0 }
  0xd3   :  { %v238_v45 = vmax.f32 %v406_v27, 0.0 }
  0xd4   :  { %v182_v28 = vpop.f32.mrf.mxu0 }
  0xd5   :  { %v237_v46 = vmax.f32 %v182_v28, 0.0 }
  0xd6   :  { %v409_v29 = vpop.f32.mrf.mxu0 }
  0xd7   :  { %v240_v43 = vmax.f32 %v409_v29, 0.0 }
  0xd8   :  { %v192_v30 = vpop.f32.mrf.mxu0 }
  0xd9   :  { %v239_v44 = vmax.f32 %v192_v30, 0.0 }
  0xda   :  { %v412_v31 = vpop.f32.mrf.mxu0 }
  0xdb   :  { %v242_v41 = vmax.f32 %v412_v31, 0.0 }
  0xdc   :  { %v202_v32 = vpop.f32.mrf.mxu0 }
  0xdd   :  { %v241_v42 = vmax.f32 %v202_v32, 0.0 }
  0xde   :  { %v415_v33 = vpop.f32.mrf.mxu0 }
  0xdf   :  { %v244_v39 = vmax.f32 %v415_v33, 0.0 }
  0xe0   :  { %v212_v34 = vpop.f32.mrf.mxu0 }
  0xe1   :  { %v243_v40 = vmax.f32 %v212_v34, 0.0 }
  0xe2   :  { %v418_v35 = vpop.f32.mrf.mxu0 }
  0xe3   :  { %v246_v36 = vmax.f32 %v418_v35, 0.0 }
  0xe4   :  { %v222_v37 = vpop.f32.mrf.mxu0 }
  0xe5   :  { %v245_v38 = vmax.f32 %v222_v37, 0.0  ;;  %420 = vmatpush3.msra.mxu1 %v246_v36 }
  0xe6   :  { %421 = vmatprep.subr.mxu1 %v481_v18 }
  0xe7   :  { %422 = vmatpush3.msra.mxu1 %v245_v38 }
  0xe8   :  { %423 = vmatprep.subr.mxu1 %v481_v18 }
  0xe9   :  { %424 = vmatpush3.msra.mxu1 %v244_v39 }
  0xea   :  { %425 = vmatprep.subr.mxu1 %v481_v18 }
  0xeb   :  { %426 = vmatpush3.msra.mxu1 %v243_v40 }
  0xec   :  { %427 = vmatprep.subr.mxu1 %v481_v18 }
  0xed   :  { %428 = vmatpush3.msra.mxu1 %v242_v41 }
  0xee   :  { %429 = vmatprep.subr.mxu1 %v481_v18 }
  0xef   :  { %430 = vmatpush3.msra.mxu1 %v241_v42 }
  0xf0   :  { %431 = vmatprep.subr.mxu1 %v481_v18 }
  0xf1   :  { %432 = vmatpush3.msra.mxu1 %v240_v43 }
  0xf2   :  { %433 = vmatprep.subr.mxu1 %v481_v18 }
  0xf3   :  { %434 = vmatpush3.msra.mxu1 %v239_v44 }
  0xf4   :  { %435 = vmatprep.subr.mxu1 %v481_v18 }
  0xf5   :  { %436 = vmatpush3.msra.mxu1 %v238_v45 }
  0xf6   :  { %437 = vmatprep.subr.mxu1 %v481_v18 }
  0xf7   :  { %438 = vmatpush3.msra.mxu1 %v237_v46 }
  0xf8   :  { %439 = vmatprep.subr.mxu1 %v481_v18 }
  0xf9   :  { %440 = vmatpush3.msra.mxu1 %v236_v47 }
  0xfa   :  { %441 = vmatprep.subr.mxu1 %v481_v18 }
  0xfb   :  { %442 = vmatpush3.msra.mxu1 %v235_v48 }
  0xfc   :  { %443 = vmatprep.subr.mxu1 %v481_v18 }
  0xfd   :  { %444 = vmatpush3.msra.mxu1 %v234_v49 }
  0xfe   :  { %445 = vmatprep.subr.mxu1 %v481_v18 }
  0xff   :  { %446 = vmatpush3.msra.mxu1 %v233_v50 }
 0x100   :  { %447 = vmatprep.subr.mxu1 %v481_v18 }
 0x101   :  { %448 = vmatpush3.msra.mxu1 %v232_v51 }
 0x102   :  { %449 = vmatprep.subr.mxu1 %v481_v18 }
 0x103   :  { %450 = vmatpush3.msra.mxu1 %v231_v52 }
 0x104   :  { %452 = vmatmul.mubr.f32.vlgmr.msra.gmra.mxu1 %v247_v53 }
 0x1c4   :  { %v324_v59 = vpop.f32.mrf.mxu1 }
 0x1c5   :  { %v325_v60 = vadd.f32 %v324_v59, %v257_v58 }
 0x1c6   :  { %v453_v61 = vpop.f32.mrf.mxu1 }
 0x1c7   :  { %328 = vst [vmem:[#allocation3] sm:$0x1] %v325_v60 }
 0x1c8   :  { %470 = shalt.err (!%p467_p4)
}
 0x1c9   :  { %338 = dma.vmem_to_hbm [thread:$0]  %s336_s0, 16, %s607_s4, [#allocation4]  }
 0x1ca   :  { %479 = dma.done.wait [#allocation4], 16  }
 0x1cb   :  { %480 = vsyncadd [#allocation4], 4294967280 }
 0x1cc   :  { %342 = vsyncpa [#allocation4], 1 }

</bundles_post_ra>
